<compile_context>
chip_gen: v7x
topology: tpu7x:2x2x1
jax: 0.10.0
libtpu: 0.0.40
codegen_flags: <defaults>
</compile_context>

<pallas_src>
import functools

import jax
import jax.numpy as jnp
from jax import lax
from jax.experimental import pallas as pl
from jax.experimental.pallas import tpu as pltpu


def _cross_attn_kernel(x_ref, ctx_ref,
                       wq_ref, bq_ref,
                       wk_ref, bk_ref,
                       wvo_ref, bvo_ref,
                       wx_ref, bo_ref,
                       o_ref, *, compute_dtype):
    cd = compute_dtype
    B = x_ref.shape[0]          # static

    outs = []
    for b in range(B):          # static unroll over the (tiny) batch
        x = x_ref[b]            # [Cin, HW]  channels on sublanes, tokens on lanes
        ctx = ctx_ref[b]        # [E,   S ]
        xc = x.astype(cd)
        cc = ctx.astype(cd)

        # Q with proj_in + scale folded in:  q = (scale*Wq@W_in)@x + scale*(Wq@b_in + bq)
        q = jnp.dot(wq_ref[...], xc,
                    preferred_element_type=jnp.float32) + bq_ref[...]          # [E, HW]
        # K projection (PyTorch Linear, y = W x in channel-major form).
        k = jnp.dot(wk_ref[...], cc,
                    preferred_element_type=jnp.float32) + bk_ref[...]          # [E, S]

        # Scores key-major, no explicit k.T: contract the E (sublane) axis of both operands.
        att_t = lax.dot_general(k.astype(cd), q.astype(cd),
                                dimension_numbers=(((0,), (0,)), ((), ())),
                                preferred_element_type=jnp.float32)            # [S, HW]
        # TODO(synk): pad_mask (masked_fill with -1e9) not wired in; the module is used with pad_mask=None.

        # Softmax over keys == sublane axis 0, kept in f32 (v5e has no bf16 VPU/EUP),
        # denominator via the (free) EUP approx reciprocal.
        att_t = att_t - jnp.max(att_t, axis=0, keepdims=True)
        p = jnp.exp(att_t)
        p = p * pl.reciprocal(jnp.sum(p, axis=0, keepdims=True), approx=True)  # [S, HW]

        # V with the attention half of proj_out folded in -> only Cin rows.
        v = jnp.dot(wvo_ref[...], cc,
                    preferred_element_type=jnp.float32) + bvo_ref[...]         # [Cin, S]
        attn = jnp.dot(v.astype(cd), p.astype(cd),
                       preferred_element_type=jnp.float32)                     # [Cin, HW]

        # Residual half of proj_out on the RAW input, plus output bias.
        out_b = attn + jnp.dot(wx_ref[...], xc,
                               preferred_element_type=jnp.float32) + bo_ref[...]
        outs.append(out_b)

    # One lane-dense [B*Cin, HW] unmasked slab store.
    o_ref[...] = jnp.concatenate(outs, axis=0).astype(o_ref.dtype)


def cross_attention(input_nchw, context_nchw, params, *, use_bf16=True):
    """input_nchw: [B, Cin, H, W]; context_nchw: [B, E, Hc, Wc].

    use_bf16=True feeds bf16 operands to the MXU (beneficial on v5e/v6e/v7x alike —
    v5e's MXU is bf16-native); softmax and all accumulation stay f32.
    """
    B, Cin, H, W = input_nchw.shape
    _, E, Hc, Wc = context_nchw.shape
    HW = H * W
    S = Hc * Wc
    scale = float(E) ** (-0.5)
    cd = jnp.bfloat16 if use_bf16 else jnp.float32

    # Channel-major flattening: pure reshapes only (no XLA transpose HBM passes).
    x = input_nchw.reshape(B, Cin, HW)       # [B, Cin, HW]
    ctx = context_nchw.reshape(B, E, S)      # [B, E, S]

    # ---- Host-side algebraic folds (all in f32, exact reassociation) ----
    w_in = params["w_in"]                    # [E, Cin]
    b_in = params["b_in"].reshape(E, 1)
    wq = params["wq"]
    bq = params["bq"].reshape(E, 1)
    wk = params["wk"]
    bk = params["bk"].reshape(E, 1)
    wv = params["wv"]
    bv = params["bv"].reshape(E, 1)
    w_out = params["w_out"]                  # [Cin, Cin+E]; columns = [x | attn_out]
    b_out = params["b_out"].reshape(Cin, 1)

    w_x = w_out[:, :Cin]                     # residual half of proj_out
    w_attn = w_out[:, Cin:]                  # attention half of proj_out

    wq_f = ((wq @ w_in) * scale).astype(cd)  # [E, Cin]  proj_in + scale folded into Q
    bq_f = (wq @ b_in + bq) * scale          # [E, 1]    stays f32
    wk_c = wk.astype(cd)                     # [E, E]
    wvo = (w_attn @ wv).astype(cd)           # [Cin, E]  proj_out(attn) folded into V
    bvo = w_attn @ bv                        # [Cin, 1]  stays f32
    wx_c = w_x.astype(cd)                    # [Cin, Cin]

    args = (x, ctx, wq_f, bq_f, wk_c, bk, wvo, bvo, wx_c, b_out)

    # Cost hint so XLA can overlap this tiny, latency-bound call with surrounding ops.
    flops = 2 * B * (E * Cin * HW + E * E * S + E * S * HW
                     + Cin * E * S + Cin * S * HW + Cin * Cin * HW)
    transcendentals = B * S * HW
    bytes_accessed = sum(int(a.size) * a.dtype.itemsize for a in args) + B * Cin * HW * 4

    vmem = pl.BlockSpec(memory_space=pltpu.MemorySpace.VMEM)

    # Single invocation (no grid): at these shapes the problem is step-overhead bound,
    # so everything stays VMEM-resident and the batch loop is unrolled in-kernel.
    out_flat = pl.pallas_call(
        functools.partial(_cross_attn_kernel, compute_dtype=cd),
        out_shape=jax.ShapeDtypeStruct((B * Cin, HW), jnp.float32),
        in_specs=[vmem] * len(args),
        out_specs=vmem,
        cost_estimate=pl.CostEstimate(flops=flops,
                                      transcendentals=transcendentals,
                                      bytes_accessed=bytes_accessed),
    )(*args)

    # [B*Cin, HW] and [B, Cin, H, W] share the same layout -> reshape only.
    return out_flat.reshape(B, Cin, H, W)


def init_params(key, in_channels, emb_dim):
    ks = jax.random.split(key, 10)
    s = 0.05
    return {
        "w_in": jax.random.normal(ks[0], (emb_dim, in_channels), jnp.float32) * s,
        "b_in": jax.random.normal(ks[1], (1, emb_dim), jnp.float32) * s,
        "wq": jax.random.normal(ks[2], (emb_dim, emb_dim), jnp.float32) * s,
        "bq": jax.random.normal(ks[3], (1, emb_dim), jnp.float32) * s,
        "wk": jax.random.normal(ks[4], (emb_dim, emb_dim), jnp.float32) * s,
        "bk": jax.random.normal(ks[5], (1, emb_dim), jnp.float32) * s,
        "wv": jax.random.normal(ks[6], (emb_dim, emb_dim), jnp.float32) * s,
        "bv": jax.random.normal(ks[7], (1, emb_dim), jnp.float32) * s,
        "w_out": jax.random.normal(ks[8], (in_channels, in_channels + emb_dim), jnp.float32) * s,
        "b_out": jax.random.normal(ks[9], (1, in_channels), jnp.float32) * s,
    }


def cross_attention_ref(input_nchw, context_nchw, params):
    """Pure-JAX reference mirroring the PyTorch forward exactly (no folds)."""
    B, Cin, H, W = input_nchw.shape
    _, E, Hc, Wc = context_nchw.shape
    scale = float(E) ** (-0.5)
    ctx = jnp.transpose(context_nchw.reshape(B, E, Hc * Wc), (0, 2, 1))      # [B,S,E]
    x = jnp.transpose(input_nchw.reshape(B, Cin, H * W), (0, 2, 1))          # [B,HW,Cin]
    xp = x @ params["w_in"].T + params["b_in"]
    q = xp @ params["wq"].T + params["bq"]
    k = ctx @ params["wk"].T + params["bk"]
    v = ctx @ params["wv"].T + params["bv"]
    att = jnp.einsum("bid,bjd->bij", q, k) * scale
    att = jax.nn.softmax(att, axis=-1)
    out = jnp.einsum("bij,bjd->bid", att, v)                                  # [B,HW,E]
    cat = jnp.concatenate([x, out], axis=-1)                                  # [B,HW,Cin+E]
    out = cat @ params["w_out"].T + params["b_out"]
    return jnp.transpose(out, (0, 2, 1)).reshape(B, Cin, H, W)


if __name__ == "__main__":
    B, Cin, H, W = 2, 4, 16, 16       # HW = 256 -> lane-dense slabs
    E, Hc, Wc = 32, 4, 4              # S = 16

    key = jax.random.PRNGKey(0)
    k_in, k_ctx, k_par = jax.random.split(key, 3)
    input_nchw = jax.random.normal(k_in, (B, Cin, H, W), jnp.float32)
    context_nchw = jax.random.normal(k_ctx, (B, E, Hc, Wc), jnp.float32)
    params = init_params(k_par, Cin, E)

    ref = cross_attention_ref(input_nchw, context_nchw, params)

    # f32 MXU-operand path (validates the algebraic folds tightly).
    out_f32 = jax.block_until_ready(
        cross_attention(input_nchw, context_nchw, params, use_bf16=False))
    assert out_f32.shape == (B, Cin, H, W)
    assert jnp.allclose(out_f32, ref, atol=2e-3, rtol=2e-3), "f32 kernel mismatch vs reference"

    # Default bf16 MXU-operand path (fast on v5e/v6e/v7x); softmax/accumulation stay f32.
    out_bf16 = jax.block_until_ready(cross_attention(input_nchw, context_nchw, params))
    assert jnp.allclose(out_bf16, ref, atol=5e-2, rtol=5e-2), "bf16 kernel mismatch vs reference"

    print("KERNEL_OK")
</pallas_src>

<mosaic_0001>
module attributes {stable_mosaic.version = 11 : i64} {
  func.func @_cross_attn_kernel(%arg0: memref<2x4x256xf32, #tpu.memory_space<vmem>>, %arg1: memref<2x32x16xf32, #tpu.memory_space<vmem>>, %arg2: memref<32x4xf32, #tpu.memory_space<vmem>>, %arg3: memref<32x1xf32, #tpu.memory_space<vmem>>, %arg4: memref<32x32xf32, #tpu.memory_space<vmem>>, %arg5: memref<32x1xf32, #tpu.memory_space<vmem>>, %arg6: memref<4x32xf32, #tpu.memory_space<vmem>>, %arg7: memref<4x1xf32, #tpu.memory_space<vmem>>, %arg8: memref<4x4xf32, #tpu.memory_space<vmem>>, %arg9: memref<4x1xf32, #tpu.memory_space<vmem>>, %arg10: memref<8x256xf32, #tpu.memory_space<vmem>>) attributes {dimension_semantics = [], scalar_prefetch = 0 : i64, scratch_operands = 0 : i64, tpu.core_type = #tpu.core_type<tc>} {
    %c0 = arith.constant 0 : index
    %c0_0 = arith.constant 0 : index
    %c0_1 = arith.constant 0 : index
    %0 = vector.load %arg0[%c0, %c0_0, %c0_1] : memref<2x4x256xf32, #tpu.memory_space<vmem>>, vector<1x4x256xf32>
    %1 = vector.shape_cast %0 : vector<1x4x256xf32> to vector<4x256xf32>
    %c0_2 = arith.constant 0 : index
    %c0_3 = arith.constant 0 : index
    %c0_4 = arith.constant 0 : index
    %2 = vector.load %arg1[%c0_2, %c0_3, %c0_4] : memref<2x32x16xf32, #tpu.memory_space<vmem>>, vector<1x32x16xf32>
    %3 = vector.shape_cast %2 : vector<1x32x16xf32> to vector<32x16xf32>
    %c0_5 = arith.constant 0 : index
    %c0_6 = arith.constant 0 : index
    %4 = vector.load %arg2[%c0_5, %c0_6] : memref<32x4xf32, #tpu.memory_space<vmem>>, vector<32x4xf32>
    %cst = arith.constant dense<0.000000e+00> : vector<32x256xf32>
    %5 = tpu.matmul %4, %1, %cst {dimension_numbers = #tpu.dot_dimension_numbers<[1], [0], [0], [1], [0, 0, 1, 1], [], []>} : vector<32x4xf32>, vector<4x256xf32>, vector<32x256xf32> -> vector<32x256xf32>
    %c0_7 = arith.constant 0 : index
    %c0_8 = arith.constant 0 : index
    %6 = vector.load %arg3[%c0_7, %c0_8] : memref<32x1xf32, #tpu.memory_space<vmem>>, vector<32x1xf32>
    %7 = vector.broadcast %6 : vector<32x1xf32> to vector<32x256xf32>
    %8 = arith.addf %5, %7 : vector<32x256xf32>
    %c0_9 = arith.constant 0 : index
    %c0_10 = arith.constant 0 : index
    %9 = vector.load %arg4[%c0_9, %c0_10] : memref<32x32xf32, #tpu.memory_space<vmem>>, vector<32x32xf32>
    %cst_11 = arith.constant dense<0.000000e+00> : vector<32x16xf32>
    %10 = tpu.matmul %9, %3, %cst_11 {dimension_numbers = #tpu.dot_dimension_numbers<[1], [0], [0], [1], [0, 0, 1, 1], [], []>} : vector<32x32xf32>, vector<32x16xf32>, vector<32x16xf32> -> vector<32x16xf32>
    %c0_12 = arith.constant 0 : index
    %c0_13 = arith.constant 0 : index
    %11 = vector.load %arg5[%c0_12, %c0_13] : memref<32x1xf32, #tpu.memory_space<vmem>>, vector<32x1xf32>
    %12 = vector.broadcast %11 : vector<32x1xf32> to vector<32x16xf32>
    %13 = arith.addf %10, %12 : vector<32x16xf32>
    %cst_14 = arith.constant dense<0.000000e+00> : vector<16x256xf32>
    %14 = tpu.matmul %13, %8, %cst_14 {dimension_numbers = #tpu.dot_dimension_numbers<[0], [0], [1], [1], [0, 1, 1, 1], [], []>} : vector<32x16xf32>, vector<32x256xf32>, vector<16x256xf32> -> vector<16x256xf32>
    %cst_15 = arith.constant dense<0xFF800000> : vector<256xf32>
    %15 = vector.multi_reduction <maximumf>, %14, %cst_15 [0] : vector<16x256xf32> to vector<256xf32>
    %16 = vector.shape_cast %15 : vector<256xf32> to vector<1x256xf32>
    %17 = vector.broadcast %16 : vector<1x256xf32> to vector<16x256xf32>
    %18 = arith.subf %14, %17 : vector<16x256xf32>
    %19 = math.exp %18 : vector<16x256xf32>
    %cst_16 = arith.constant dense<0.000000e+00> : vector<256xf32>
    %20 = vector.multi_reduction <add>, %19, %cst_16 [0] : vector<16x256xf32> to vector<256xf32>
    %21 = vector.shape_cast %20 : vector<256xf32> to vector<1x256xf32>
    %22 = tpu.reciprocal %21 {approx = true} : vector<1x256xf32> -> vector<1x256xf32>
    %23 = vector.broadcast %22 : vector<1x256xf32> to vector<16x256xf32>
    %24 = arith.mulf %19, %23 : vector<16x256xf32>
    %c0_17 = arith.constant 0 : index
    %c0_18 = arith.constant 0 : index
    %25 = vector.load %arg6[%c0_17, %c0_18] : memref<4x32xf32, #tpu.memory_space<vmem>>, vector<4x32xf32>
    %cst_19 = arith.constant dense<0.000000e+00> : vector<4x16xf32>
    %26 = tpu.matmul %25, %3, %cst_19 {dimension_numbers = #tpu.dot_dimension_numbers<[1], [0], [0], [1], [0, 0, 1, 1], [], []>} : vector<4x32xf32>, vector<32x16xf32>, vector<4x16xf32> -> vector<4x16xf32>
    %c0_20 = arith.constant 0 : index
    %c0_21 = arith.constant 0 : index
    %27 = vector.load %arg7[%c0_20, %c0_21] : memref<4x1xf32, #tpu.memory_space<vmem>>, vector<4x1xf32>
    %28 = vector.broadcast %27 : vector<4x1xf32> to vector<4x16xf32>
    %29 = arith.addf %26, %28 : vector<4x16xf32>
    %cst_22 = arith.constant dense<0.000000e+00> : vector<4x256xf32>
    %30 = tpu.matmul %29, %24, %cst_22 {dimension_numbers = #tpu.dot_dimension_numbers<[1], [0], [0], [1], [0, 0, 1, 1], [], []>} : vector<4x16xf32>, vector<16x256xf32>, vector<4x256xf32> -> vector<4x256xf32>
    %c0_23 = arith.constant 0 : index
    %c0_24 = arith.constant 0 : index
    %31 = vector.load %arg8[%c0_23, %c0_24] : memref<4x4xf32, #tpu.memory_space<vmem>>, vector<4x4xf32>
    %cst_25 = arith.constant dense<0.000000e+00> : vector<4x256xf32>
    %32 = tpu.matmul %31, %1, %cst_25 {dimension_numbers = #tpu.dot_dimension_numbers<[1], [0], [0], [1], [0, 0, 1, 1], [], []>} : vector<4x4xf32>, vector<4x256xf32>, vector<4x256xf32> -> vector<4x256xf32>
    %33 = arith.addf %30, %32 : vector<4x256xf32>
    %c0_26 = arith.constant 0 : index
    %c0_27 = arith.constant 0 : index
    %34 = vector.load %arg9[%c0_26, %c0_27] : memref<4x1xf32, #tpu.memory_space<vmem>>, vector<4x1xf32>
    %35 = vector.broadcast %34 : vector<4x1xf32> to vector<4x256xf32>
    %36 = arith.addf %33, %35 : vector<4x256xf32>
    %c1 = arith.constant 1 : index
    %c0_28 = arith.constant 0 : index
    %c0_29 = arith.constant 0 : index
    %37 = vector.load %arg0[%c1, %c0_28, %c0_29] : memref<2x4x256xf32, #tpu.memory_space<vmem>>, vector<1x4x256xf32>
    %38 = vector.shape_cast %37 : vector<1x4x256xf32> to vector<4x256xf32>
    %c1_30 = arith.constant 1 : index
    %c0_31 = arith.constant 0 : index
    %c0_32 = arith.constant 0 : index
    %39 = vector.load %arg1[%c1_30, %c0_31, %c0_32] : memref<2x32x16xf32, #tpu.memory_space<vmem>>, vector<1x32x16xf32>
    %40 = vector.shape_cast %39 : vector<1x32x16xf32> to vector<32x16xf32>
    %c0_33 = arith.constant 0 : index
    %c0_34 = arith.constant 0 : index
    %41 = vector.load %arg2[%c0_33, %c0_34] : memref<32x4xf32, #tpu.memory_space<vmem>>, vector<32x4xf32>
    %cst_35 = arith.constant dense<0.000000e+00> : vector<32x256xf32>
    %42 = tpu.matmul %41, %38, %cst_35 {dimension_numbers = #tpu.dot_dimension_numbers<[1], [0], [0], [1], [0, 0, 1, 1], [], []>} : vector<32x4xf32>, vector<4x256xf32>, vector<32x256xf32> -> vector<32x256xf32>
    %c0_36 = arith.constant 0 : index
    %c0_37 = arith.constant 0 : index
    %43 = vector.load %arg3[%c0_36, %c0_37] : memref<32x1xf32, #tpu.memory_space<vmem>>, vector<32x1xf32>
    %44 = vector.broadcast %43 : vector<32x1xf32> to vector<32x256xf32>
    %45 = arith.addf %42, %44 : vector<32x256xf32>
    %c0_38 = arith.constant 0 : index
    %c0_39 = arith.constant 0 : index
    %46 = vector.load %arg4[%c0_38, %c0_39] : memref<32x32xf32, #tpu.memory_space<vmem>>, vector<32x32xf32>
    %cst_40 = arith.constant dense<0.000000e+00> : vector<32x16xf32>
    %47 = tpu.matmul %46, %40, %cst_40 {dimension_numbers = #tpu.dot_dimension_numbers<[1], [0], [0], [1], [0, 0, 1, 1], [], []>} : vector<32x32xf32>, vector<32x16xf32>, vector<32x16xf32> -> vector<32x16xf32>
    %c0_41 = arith.constant 0 : index
    %c0_42 = arith.constant 0 : index
    %48 = vector.load %arg5[%c0_41, %c0_42] : memref<32x1xf32, #tpu.memory_space<vmem>>, vector<32x1xf32>
    %49 = vector.broadcast %48 : vector<32x1xf32> to vector<32x16xf32>
    %50 = arith.addf %47, %49 : vector<32x16xf32>
    %cst_43 = arith.constant dense<0.000000e+00> : vector<16x256xf32>
    %51 = tpu.matmul %50, %45, %cst_43 {dimension_numbers = #tpu.dot_dimension_numbers<[0], [0], [1], [1], [0, 1, 1, 1], [], []>} : vector<32x16xf32>, vector<32x256xf32>, vector<16x256xf32> -> vector<16x256xf32>
    %cst_44 = arith.constant dense<0xFF800000> : vector<256xf32>
    %52 = vector.multi_reduction <maximumf>, %51, %cst_44 [0] : vector<16x256xf32> to vector<256xf32>
    %53 = vector.shape_cast %52 : vector<256xf32> to vector<1x256xf32>
    %54 = vector.broadcast %53 : vector<1x256xf32> to vector<16x256xf32>
    %55 = arith.subf %51, %54 : vector<16x256xf32>
    %56 = math.exp %55 : vector<16x256xf32>
    %cst_45 = arith.constant dense<0.000000e+00> : vector<256xf32>
    %57 = vector.multi_reduction <add>, %56, %cst_45 [0] : vector<16x256xf32> to vector<256xf32>
    %58 = vector.shape_cast %57 : vector<256xf32> to vector<1x256xf32>
    %59 = tpu.reciprocal %58 {approx = true} : vector<1x256xf32> -> vector<1x256xf32>
    %60 = vector.broadcast %59 : vector<1x256xf32> to vector<16x256xf32>
    %61 = arith.mulf %56, %60 : vector<16x256xf32>
    %c0_46 = arith.constant 0 : index
    %c0_47 = arith.constant 0 : index
    %62 = vector.load %arg6[%c0_46, %c0_47] : memref<4x32xf32, #tpu.memory_space<vmem>>, vector<4x32xf32>
    %cst_48 = arith.constant dense<0.000000e+00> : vector<4x16xf32>
    %63 = tpu.matmul %62, %40, %cst_48 {dimension_numbers = #tpu.dot_dimension_numbers<[1], [0], [0], [1], [0, 0, 1, 1], [], []>} : vector<4x32xf32>, vector<32x16xf32>, vector<4x16xf32> -> vector<4x16xf32>
    %c0_49 = arith.constant 0 : index
    %c0_50 = arith.constant 0 : index
    %64 = vector.load %arg7[%c0_49, %c0_50] : memref<4x1xf32, #tpu.memory_space<vmem>>, vector<4x1xf32>
    %65 = vector.broadcast %64 : vector<4x1xf32> to vector<4x16xf32>
    %66 = arith.addf %63, %65 : vector<4x16xf32>
    %cst_51 = arith.constant dense<0.000000e+00> : vector<4x256xf32>
    %67 = tpu.matmul %66, %61, %cst_51 {dimension_numbers = #tpu.dot_dimension_numbers<[1], [0], [0], [1], [0, 0, 1, 1], [], []>} : vector<4x16xf32>, vector<16x256xf32>, vector<4x256xf32> -> vector<4x256xf32>
    %c0_52 = arith.constant 0 : index
    %c0_53 = arith.constant 0 : index
    %68 = vector.load %arg8[%c0_52, %c0_53] : memref<4x4xf32, #tpu.memory_space<vmem>>, vector<4x4xf32>
    %cst_54 = arith.constant dense<0.000000e+00> : vector<4x256xf32>
    %69 = tpu.matmul %68, %38, %cst_54 {dimension_numbers = #tpu.dot_dimension_numbers<[1], [0], [0], [1], [0, 0, 1, 1], [], []>} : vector<4x4xf32>, vector<4x256xf32>, vector<4x256xf32> -> vector<4x256xf32>
    %70 = arith.addf %67, %69 : vector<4x256xf32>
    %c0_55 = arith.constant 0 : index
    %c0_56 = arith.constant 0 : index
    %71 = vector.load %arg9[%c0_55, %c0_56] : memref<4x1xf32, #tpu.memory_space<vmem>>, vector<4x1xf32>
    %72 = vector.broadcast %71 : vector<4x1xf32> to vector<4x256xf32>
    %73 = arith.addf %70, %72 : vector<4x256xf32>
    %74 = tpu.concatenate %36, %73 in 0 : vector<4x256xf32>, vector<4x256xf32> -> vector<8x256xf32>
    %c0_57 = arith.constant 0 : index
    %c0_58 = arith.constant 0 : index
    %75 = vector.load %arg10[%c0_57, %c0_58] : memref<8x256xf32, #tpu.memory_space<vmem>>, vector<8x256xf32>
    tpu.vector_store %arg10[%c0_57, %c0_58], %74 {strides = array<i32>} : memref<8x256xf32, #tpu.memory_space<vmem>>, vector<8x256xf32>,
    return
  }
}

</mosaic_0001>

<bundles_post_ra>
// kernel: tpu_custom_call.1
= control target key start
LH: loop header
LB: loop body
LE: loop exit
PB: predicated region body
PF: predicated region fallthrough
CT: control target
= control target key end

     0   :  { %vm84_vm0 = vcmask 1043456   ;;  %v1522_v2 = vmov 0.0   ;;  %vm71_vm1 = vcmask 31744   ;;  %vm206_vm2 = vcmask 261120   ;;  %s1852_s0 = inlined_call_operand.vmem [shape: f32[2,4,256], index: 0, kind: input, shape index: {}]   ;;  %s1853_s1 = inlined_call_operand.vmem [shape: f32[2,32,16], index: 1, kind: input, shape index: {}]   ;;  %s1854_s2 = inlined_call_operand.vmem [shape: f32[32,4], index: 2, kind: input, shape index: {}]   ;;  %s1855_s3 = inlined_call_operand.vmem [shape: f32[32,1], index: 3, kind: input, shape index: {}]   ;;  %s1856_s4 = inlined_call_operand.vmem [shape: f32[32,32], index: 4, kind: input, shape index: {}]   ;;  %s1857_s5 = inlined_call_operand.vmem [shape: f32[32,1], index: 5, kind: input, shape index: {}]   ;;  %s1858_s6 = inlined_call_operand.vmem [shape: f32[4,32], index: 6, kind: input, shape index: {}]   ;;  %s1859_s7 = inlined_call_operand.vmem [shape: f32[4,1], index: 7, kind: input, shape index: {}]   ;;  %s1860_s8 = inlined_call_operand.vmem [shape: f32[4,4], index: 8, kind: input, shape index: {}]   ;;  %s1861_s9 = inlined_call_operand.vmem [shape: f32[4,1], index: 9, kind: input, shape index: {}]   ;;  %s1862_s10 = inlined_call_operand.hbm [shape: f32[8,256], index: 10, kind: output, shape index: {}]  }
   0x1   :  { %v36_v0 = vld [vmem:[%s1852_s0] sm:$0xff]  ;;  %153 = vmatprep.mubr.f32.mxu0 %v1522_v2  ;;  %165 = vmatprep.mubr.f32.mxu1 %v1522_v2  ;;  %v38_v5 = vld [vmem:[%s1853_s1 + $0x8] sm:$0xff]  ;;  %v1601_v6 = vld [vmem:[%s1854_s2 + $0x10] sm:$0xff] }
   0x2   :  { %v70_v1 = vcombine.high %v36_v0, %v36_v0  ;;  %v1590_v3 = vld [vmem:[%s1854_s2] sm:$0xff]  ;;  %v39_v8 = vld [vmem:[%s1853_s1 + $0x10] sm:$0xff]  ;;  %v40_v9 = vld [vmem:[%s1853_s1 + $0x18] sm:$0xff] }
   0x3   :  { %v37_v4 = vld [vmem:[%s1853_s1] sm:$0xff]  ;;  %v1411_v10 = vpack.c.bf16 %v40_v9, %v39_v8  ;;  %v1621_v11 = vld [vmem:[%s1854_s2 + $0x8] sm:$0xff]  ;;  %v1626_v12 = vld [vmem:[%s1854_s2 + $0x18] sm:$0xff] }
   0x4   :  { %v1407_v7 = vpack.c.bf16 %v38_v5, %v37_v4  ;;  %1292 = vmatprep.subr.msk.mxu0 %vm84_vm0, %v70_v1  ;;  %1459 = vmatprep.subr.msk.mxu1 %vm84_vm0, %v70_v1  ;;  %v1632_v13 = vld [vmem:[%s1856_s4] sm:$0xff] }
   0x5   :  { %1293 = vmatpush1.msk.msra.mxu0 %vm84_vm0, %v36_v0  ;;  %1460 = vmatpush1.msk.msra.mxu1 %vm84_vm0, %v36_v0 }
   0x6   :  { %1294 = vmatmul.mubr.msk.f32.vlgmr.msra.gmra.mrb[0].mxu0 %vm71_vm1, %v1590_v3  ;;  %1296 = vmatmul.mubr.msk.f32.vlgmr.msra.gmra.mrb[0].mxu1 %vm71_vm1, %v1601_v6 }
   0x7   :  { %1408 = vmatprep.subr.bf16.mxu1 %v1407_v7  ;;  %159 = vmatprep.mubr.f32.mxu0 %v1522_v2 }
   0x8   :  { %1410 = vmatpush3.bf16.msra.mxu1 %v1407_v7  ;;  %171 = vmatprep.mubr.f32.mxu1 %v1522_v2 }
   0x9   :  { %15 = vsyncpa [#allocation3], 0  ;;  %1412 = vmatprep.subr.bf16.mxu1 %v1411_v10  ;;  %v1523_v14 = vmov 0.0|0.0   ;;  %v182_v15 = vld [vmem:[%s1857_s5] sm:$0xff]  ;;  %v1647_v16 = vld [vmem:[%s1856_s4 + $0x8] sm:$0xff]  ;;  %vm1524_vm3 = vmmov 0  }
   0xa   :  { %1423 = vmatprep.subr.bf16.mxu0 %v1523_v14  ;;  %1295 = vmatmul.mubr.msk.f32.gmra.mrb[2].mxu0 %vm71_vm1, %v1621_v11  ;;  %v1653_v17 = vld [vmem:[%s1856_s4 + $0x10] sm:$0xff]  ;;  %v1525_v18 = vmov 0   ;;  %v1665_v20 = vld [vmem:[%s1858_s6] sm:$0xf]  ;;  %v183_v21 = vld [vmem:[%s1857_s5 + $0x8] sm:$0xff]  ;;  %vm620_vm4 = vcmask 130048  }
   0xb   :  { %1297 = vmatmul.mubr.msk.f32.gmra.mrb[2].mxu1 %vm71_vm1, %v1626_v12  ;;  %1425 = vmatpush3.bf16.msra.mxu0 %v1407_v7  ;;  %v184_v19 = vld [vmem:[%s1857_s5 + $0x10] sm:$0xff]  ;;  %v1675_v22 = vld [vmem:[%s1856_s4 + $0x18] sm:$0xff]  ;;  %v45_v24 = vld [vmem:[%s1855_s3] sm:$0xff] }
   0xc   :  { %1365 = vmatprep.mubr.msk.f32.mxu1 %vm206_vm2, %v1632_v13  ;;  %1414 = vmatpush3.bf16.msra.mxu1 %v1411_v10  ;;  %v185_v23 = vld [vmem:[%s1857_s5 + $0x18] sm:$0xff]  ;;  %v46_v25 = vld [vmem:[%s1855_s3 + $0x8] sm:$0xff]  ;;  %v47_v26 = vld [vmem:[%s1855_s3 + $0x10] sm:$0xff] }
   0xd   :  { %1426 = vmatprep.subr.bf16.mxu0 %v1523_v14  ;;  %1379 = vmatprep.mubr.msk.f32.mxu0 %vm1524_vm3, %v1522_v2  ;;  %v48_v27 = vld [vmem:[%s1855_s3 + $0x18] sm:$0xff]  ;;  %v466_v28 = vld [vmem:[%s1859_s7] sm:$0xf]  ;;  %v1735_v4 = vld [vmem:[%s1852_s0 + $0x8] sm:$0xff] }
   0xe   :  { %1470 = vset.pattern.permute.xlu0 %v1525_v18  ;;  %1471 = vset.pattern.permute.xlu1 %v1525_v18  ;;  %v1739_v5 = vcombine.high %v1735_v4, %v1735_v4  ;;  %v695_v8 = vld [vmem:[%s1861_s9] sm:$0xf] }
   0xf   :  { %188 = vperm.xlu0 %1470, %v182_v15   ;;  %1366 = vmatmul.mubr.msk.f32.vlgmr.msra.gmra.mrb[4].mxu1 %vm206_vm2, %v1647_v16 }
  0x10   :  { %1428 = vmatpush3.bf16.msra.mxu0 %v1411_v10  ;;  %1368 = vmatprep.mubr.msk.f32.mxu1 %vm206_vm2, %v1653_v17 }
  0x11   :  { %198 = vperm.xlu1 %1471, %v184_v19   ;;  %1305 = vmatprep.subr.msk.mxu0 %vm84_vm0, %v70_v1 }
  0x13   :  { %1380 = vmatmul.mubr.msk.f32.vlgmr.msra.gmra.mrb[4].mxu0 %vm206_vm2, %v1665_v20  ;;  %193 = vperm.xlu0 %1470, %v183_v21  }
  0x14   :  { %1369 = vmatmul.mubr.msk.f32.gmra.mrb[6].mxu1 %vm206_vm2, %v1675_v22  ;;  %1306 = vmatpush1.msk.msra.mxu0 %vm84_vm0, %v36_v0 }
  0x15   :  { %203 = vperm.xlu1 %1471, %v185_v23   ;;  %406 = vmatprep.mubr.f32.mxu1 %v1522_v2 }
  0x16   :  { %613 = vmatprep.mubr.f32.mxu0 %v1522_v2 }
  0x17   :  { %51 = vperm.xlu0 %1470, %v45_v24  }
  0x19   :  { %56 = vperm.xlu1 %1471, %v46_v25  }
  0x1b   :  { %61 = vperm.xlu0 %1470, %v47_v26  }
  0x1d   :  { %66 = vperm.xlu1 %1471, %v48_v27  }
  0x21   :  { %469 = vperm.xlu1 %1471, %v466_v28  }
  0x8e   :  { %v1703_v29 = vpop.permute.xlu0 %188 }
  0x90   :  { %v1705_v30 = vpop.permute.xlu1 %198 }
  0x92   :  { %v1707_v31 = vpop.permute.xlu0 %193 }
  0x94   :  { %v1709_v32 = vpop.permute.xlu1 %203 }
  0x96   :  { %v1711_v33 = vpop.permute.xlu0 %51 }
  0x98   :  { %v1713_v34 = vpop.permute.xlu1 %56 }
  0x9a   :  { %v1715_v39 = vpop.permute.xlu0 %61 }
  0x9c   :  { %v1717_v40 = vpop.permute.xlu1 %66 }
  0xd9   :  { %v167_v35 = vpop.f32.mrb[0].mxu1  ;;  %v155_v36 = vpop.f32.mrb[0].mxu0 }
  0xda   :  { %v169_v37 = vpop.f32.mrb[1].mxu1  ;;  %v157_v38 = vpop.f32.mrb[1].mxu0  ;;  %v156_v41 = vadd.f32 %v155_v36, %v1711_v33  ;;  %v168_v45 = vadd.f32 %v167_v35, %v1715_v39 }
  0xdb   :  { %v158_v42 = vadd.f32 %v157_v38, %v1711_v33  ;;  %v170_v50 = vadd.f32 %v169_v37, %v1715_v39 }
  0xdd   :  { %v161_v43 = vpop.f32.mrb[2].mxu0 }
  0xde   :  { %v173_v44 = vpop.f32.mrb[2].mxu1  ;;  %v162_v46 = vadd.f32 %v161_v43, %v1713_v34  ;;  %v163_v48 = vpop.f32.mrb[3].mxu0 }
  0xdf   :  { %v174_v47 = vadd.f32 %v173_v44, %v1717_v40  ;;  %v175_v49 = vpop.f32.mrb[3].mxu1  ;;  %v164_v51 = vadd.f32 %v163_v48, %v1713_v34 }
  0xe0   :  { %v176_v52 = vadd.f32 %v175_v49, %v1717_v40  ;;  %v1417_v53 = vpack.c.bf16 %v162_v46, %v156_v41 }
  0xe1   :  { %v1421_v54 = vpack.c.bf16 %v174_v47, %v168_v45  ;;  %v1415_v55 = vpack.c.bf16 %v164_v51, %v158_v42 }
  0xe2   :  { %v1419_v56 = vpack.c.bf16 %v176_v52, %v170_v50  ;;  %v1367_v57 = vpop.f32.mrb[4].mxu1 }
  0xe3   :  { %v285_v58 = vpop.f32.mrb[5].mxu1  ;;  %1416 = vmatprep.subr.bf16.mxu1 %v1415_v55  ;;  %v291_v0 = vadd.f32 %v1367_v57, %v1707_v31 }
  0xe4   :  { %v286_v59 = vadd.f32 %v285_v58, %v1703_v29  ;;  %1418 = vmatpush1.bf16.msra.mxu1 %v1417_v53 }
  0xe5   :  { %1420 = vmatprep.subr.bf16.mxu1 %v1419_v56 }
  0xe6   :  { %v1728_v60 = vpop.f32.mrb[4].mxu0  ;;  %304 = vxpose.xlu0.b32.start [1/4] (short) (narrow) %v286_v59, 16 }
  0xe7   :  { %v1370_v61 = vpop.f32.mrb[6].mxu1  ;;  %v1381_v62 = vpop.f32.mrb[5].mxu0 }
  0xe8   :  { %v295_v63 = vpop.f32.mrb[7].mxu1  ;;  %1422 = vmatpush1.bf16.msra.mxu1 %v1421_v54  ;;  %v301_v7 = vadd.f32 %v1370_v61, %v1709_v32 }
  0xe9   :  { %v296_v1 = vadd.f32 %v295_v63, %v1705_v30  ;;  %1314 = vmatprep.subr.msk.mxu1 %vm84_vm0, %v1739_v5 }
  0xea   :  { %305 = vxpose.xlu0.b32.cont [2/4] (short) (narrow) %v291_v0, 16 }
  0xee   :  { %306 = vxpose.xlu0.b32.cont [3/4] (short) (narrow) %v296_v1, 16 }
  0xf2   :  { %307 = vxpose.xlu0.b32.end [4/4] (short) (narrow) %v301_v7, 16 }
 0x11b   :  { %698 = vperm.xlu0 %1470, %v695_v8  }
 0x166   :  { %v320_v9 = vpop.trf.xlu0 }
 0x167   :  { %1302 = vmatmul.mubr.msk.f32.vlgmr.msra.gmra.mrb[8].mxu1 %vm206_vm2, %v320_v9 }
 0x168   :  { %412 = vmatprep.mubr.f32.mxu1 %v1522_v2  ;;  %1315 = vmatpush1.msk.msra.mxu1 %vm84_vm0, %v1735_v4 }
 0x16a   :  { %v321_v10 = vpop.trf.xlu0 }
 0x16b   :  { %1303 = vmatmul.mubr.msk.f32.gmra.mrb[10].mxu1 %vm206_vm2, %v321_v10 }
 0x16c   :  { %780 = vmatprep.mubr.f32.mxu1 %v1522_v2 }
 0x16f   :  { %1316 = vmatmul.mubr.msk.f32.vlgmr.msra.gmra.mrb[12].mxu1 %vm71_vm1, %v1590_v3  ;;  %v1768_v3 = vld [vmem:[%s1860_s8] sm:$0xf] }
 0x170   :  { %786 = vmatprep.mubr.f32.mxu1 %v1522_v2  ;;  %1307 = vmatmul.mubr.msk.f32.vlgmr.msra.gmra.mrb[6].mxu0 %vm71_vm1, %v1768_v3 }
 0x171   :  { %688 = vmatprep.mubr.f32.mxu0 %v1522_v2 }
 0x173   :  { %1317 = vmatmul.mubr.msk.f32.gmra.mrb[14].mxu1 %vm71_vm1, %v1621_v11 }
 0x174   :  { %792 = vmatprep.mubr.f32.mxu1 %v1522_v2 }
 0x177   :  { %1318 = vmatmul.mubr.msk.f32.gmra.mrb[16].mxu1 %vm71_vm1, %v1601_v6 }
 0x178   :  { %798 = vmatprep.mubr.f32.mxu1 %v1522_v2 }
 0x17b   :  { %1319 = vmatmul.mubr.msk.f32.gmra.mrb[18].mxu1 %vm71_vm1, %v1626_v12 }
 0x17c   :  { %992 = vmatprep.mubr.f32.mxu1 %v1522_v2 }
 0x23a   :  { %v408_v11 = vpop.f32.mrb[8].mxu1 }
 0x23b   :  { %v410_v15 = vpop.f32.mrb[9].mxu1 }
 0x23e   :  { %v414_v6 = vpop.f32.mrb[10].mxu1 }
 0x23f   :  { %v419_v18 = vmax.f32 %v408_v11, %v414_v6  ;;  %v416_v19 = vpop.f32.mrb[11].mxu1 }
 0x240   :  { %v426_v21 = vmax.f32 %v410_v15, %v416_v19 }
 0x241   :  { %v420_v23 = vrot.slane %v419_v18, 4 }
 0x242   :  { %v427_v12 = vrot.slane %v426_v21, 4  ;;  %v782_v24 = vpop.f32.mrb[12].mxu1 }
 0x243   :  { %v421_v25 = vmax.f32 %v419_v18, %v420_v23  ;;  %v784_v26 = vpop.f32.mrb[13].mxu1  ;;  %v783_v38 = vadd.f32 %v782_v24, %v1711_v33 }
 0x244   :  { %v428_v27 = vmax.f32 %v426_v21, %v427_v12  ;;  %v785_v44 = vadd.f32 %v784_v26, %v1711_v33 }
 0x245   :  { %v422_v28 = vrot.slane %v421_v25, 2 }
 0x246   :  { %v429_v35 = vrot.slane %v428_v27, 2  ;;  %v788_v36 = vpop.f32.mrb[14].mxu1 }
 0x247   :  { %v423_v37 = vmax.f32 %v421_v25, %v422_v28  ;;  %v789_v41 = vadd.f32 %v788_v36, %v1713_v34  ;;  %v790_v42 = vpop.f32.mrb[15].mxu1 }
 0x248   :  { %v430_v43 = vmax.f32 %v428_v27, %v429_v35  ;;  %v791_v45 = vadd.f32 %v790_v42, %v1713_v34 }
 0x249   :  { %v424_v46 = vrot.slane %v423_v37, 1  ;;  %v1443_v47 = vpack.c.bf16 %v789_v41, %v783_v38 }
 0x24a   :  { %v431_v48 = vrot.slane %v430_v43, 1  ;;  %v1441_v49 = vpack.c.bf16 %v791_v45, %v785_v44  ;;  %v794_v50 = vpop.f32.mrb[16].mxu1  ;;  %v1311_v44 = vld [vmem:[%s1853_s1 + $0x28] sm:$0xff] }
 0x24b   :  { %v425_v51 = vmax.f32 %v423_v37, %v424_v46  ;;  %v796_v52 = vpop.f32.mrb[17].mxu1  ;;  %v795_v33 = vadd.f32 %v794_v50, %v1715_v39  ;;  %v1787_v50 = vpop.permute.xlu1 %469 }
 0x24c   :  { %v432_v53 = vmax.f32 %v430_v43, %v431_v48  ;;  %1442 = vmatprep.subr.bf16.mxu1 %v1441_v49  ;;  %v797_v1 = vadd.f32 %v796_v52, %v1715_v39  ;;  %v1310_v43 = vld [vmem:[%s1853_s1 + $0x20] sm:$0xff]  ;;  %v1313_v52 = vld [vmem:[%s1853_s1 + $0x38] sm:$0xff] }
 0x24d   :  { %v433_v54 = vsub.f32 %v408_v11, %v425_v51  ;;  %v435_v55 = vsub.f32 %v414_v6, %v425_v51  ;;  %1444 = vmatpush1.bf16.msra.mxu1 %v1443_v47  ;;  %v1433_v49 = vpack.c.bf16 %v1311_v44, %v1310_v43  ;;  %v1312_v51 = vld [vmem:[%s1853_s1 + $0x30] sm:$0xff]  ;;  %s1526_s1 = smov [#allocation2]  }
 0x24e   :  { %v434_v56 = vsub.f32 %v410_v15, %v432_v53  ;;  %v436_v57 = vsub.f32 %v416_v19, %v432_v53  ;;  %v800_v58 = vpop.f32.mrb[18].mxu1  ;;  %v542_v53 = vadd.f32 %v1728_v60, %v1787_v50  ;;  %s1284_s23 = sshll.u32 %s1526_s1, 4  ;;  %s1285_s23 = int_to_ptr.vmem [resolvable:$true] %s1284_s23 }
 0x24f   :  { %v437_v59 = vmul.f32 1.442695, %v433_v54  ;;  %v441_v61 = vmul.f32 1.442695, %v435_v55  ;;  %v801_v34 = vadd.f32 %v800_v58, %v1717_v40  ;;  %v802_v62 = vpop.f32.mrb[19].mxu1  ;;  %v1437_v54 = vpack.c.bf16 %v1313_v52, %v1312_v51  ;;  %s1498_s24 = scalar_lea.vmem %s1285_s23, 256  ;;  %p1503_p1 = scmp.lt.s32.totalorder %s1285_s23, %s1285_s23 }
 0x250   :  { %v439_v63 = vmul.f32 1.442695, %v434_v56  ;;  %v443_v0 = vmul.f32 1.442695, %v436_v57  ;;  %v803_v7 = vadd.f32 %v802_v62, %v1717_v40  ;;  %p1499_p0 = scmp.ne.s32.totalorder %s1285_s23, %s1498_s24  ;;  %p1504_p2 = scmp.lt.s32.totalorder %s1498_s24, %s1498_s24 }
 0x251   :  { %1474 = vpow2.f32 %v437_v59  ;;  %v1447_v8 = vpack.c.bf16 %v801_v34, %v795_v33 }
 0x252   :  { %1476 = vpow2.f32 %v441_v61  ;;  %v1445_v9 = vpack.c.bf16 %v803_v7, %v797_v1  ;;  %p1505_p3 = por %p1504_p2, %p1503_p1 }
 0x253   :  { %1478 = vpow2.f32 %v439_v63 }
 0x254   :  { %1480 = vpow2.f32 %v443_v0  ;;  %1446 = vmatprep.subr.bf16.mxu1 %v1445_v9  ;;  %p1506_p4 = pnand %p1505_p3, %p1499_p0 }
 0x255   :  { %1448 = vmatpush1.bf16.msra.mxu1 %v1447_v8 }
 0x25b   :  { %v1475_v10 = vpop.eup %1474 }
 0x25c   :  { %v1477_v11 = vpop.eup %1476 }
 0x25d   :  { %v1479_v15 = vpop.eup %1478  ;;  %v445_v6 = vadd.f32 %v1477_v11, %v1475_v10 }
 0x25e   :  { %v1481_v18 = vpop.eup %1480 }
 0x25f   :  { %v446_v19 = vrot.slane %v445_v6, 4  ;;  %v452_v21 = vadd.f32 %v1481_v18, %v1479_v15 }
 0x261   :  { %v447_v23 = vadd.f32 %v446_v19, %v445_v6  ;;  %v453_v12 = vrot.slane %v452_v21, 4 }
 0x263   :  { %v448_v39 = vrot.slane %v447_v23, 2  ;;  %v454_v24 = vadd.f32 %v453_v12, %v452_v21 }
 0x265   :  { %v449_v40 = vadd.f32 %v448_v39, %v447_v23  ;;  %v455_v25 = vrot.slane %v454_v24, 2 }
 0x267   :  { %v450_v26 = vrot.slane %v449_v40, 1  ;;  %v456_v27 = vadd.f32 %v455_v25, %v454_v24 }
 0x269   :  { %v451_v28 = vadd.f32 %v450_v26, %v449_v40  ;;  %v457_v35 = vrot.slane %v456_v27, 1 }
 0x26b   :  { %1482 = vrcp.f32 %v451_v28  ;;  %v458_v36 = vadd.f32 %v457_v35, %v456_v27 }
 0x26d   :  { %1484 = vrcp.f32 %v458_v36 }
 0x275   :  { %v1483_v37 = vpop.eup %1482 }
 0x276   :  { %v461_v38 = vmul.f32 %v1483_v37, %v1475_v10  ;;  %v463_v41 = vmul.f32 %v1483_v37, %v1477_v11 }
 0x277   :  { %v1485_v42 = vpop.eup %1484 }
 0x278   :  { %v462_v45 = vmul.f32 %v1485_v42, %v1479_v15  ;;  %v464_v46 = vmul.f32 %v1485_v42, %v1481_v18  ;;  %v1431_v47 = vpack.c.bf16 %v463_v41, %v461_v38 }
 0x27a   :  { %v1429_v48 = vpack.c.bf16 %v464_v46, %v462_v45 }
 0x27c   :  { %1430 = vmatprep.subr.bf16.mxu0 %v1429_v48 }
 0x27d   :  { %1432 = vmatpush1.bf16.msra.mxu0 %v1431_v47 }
 0x27e   :  { %1434 = vmatprep.subr.bf16.mxu0 %v1433_v49 }
 0x280   :  { %1308 = vmatmul.mubr.msk.f32.vlgmr.msra.gmra.mrb[6].mxu0 %vm620_vm4, %v542_v53 }
 0x281   :  { %1436 = vmatpush3.bf16.msra.mxu0 %v1433_v49  ;;  %1390 = vmatprep.mubr.msk.f32.mxu0 %vm206_vm2, %v1632_v13 }
 0x282   :  { %1438 = vmatprep.subr.bf16.mxu0 %v1437_v54 }
 0x285   :  { %1440 = vmatpush3.bf16.msra.mxu0 %v1437_v54 }
 0x286   :  { %1449 = vmatprep.subr.bf16.mxu0 %v1523_v14 }
 0x288   :  { %1391 = vmatmul.mubr.msk.f32.vlgmr.msra.gmra.mrb[8].mxu0 %vm206_vm2, %v1647_v16 }
 0x289   :  { %1451 = vmatpush3.bf16.msra.mxu0 %v1433_v49  ;;  %1393 = vmatprep.mubr.msk.f32.mxu0 %vm206_vm2, %v1653_v17 }
 0x28a   :  { %1452 = vmatprep.subr.bf16.mxu0 %v1523_v14 }
 0x28c   :  { %1394 = vmatmul.mubr.msk.f32.gmra.mrb[10].mxu0 %vm206_vm2, %v1675_v22 }
 0x28d   :  { %1454 = vmatpush3.bf16.msra.mxu0 %v1437_v54  ;;  %1404 = vmatprep.mubr.msk.f32.mxu0 %vm1524_vm3, %v1522_v2 }
 0x28e   :  { %1327 = vmatprep.subr.msk.mxu0 %vm84_vm0, %v1739_v5 }
 0x290   :  { %1405 = vmatmul.mubr.msk.f32.vlgmr.msra.gmra.mrb[12].mxu0 %vm206_vm2, %v1665_v20 }
 0x291   :  { %1328 = vmatpush1.msk.msra.mxu0 %vm84_vm0, %v1735_v4  ;;  %1185 = vmatprep.mubr.f32.mxu0 %v1522_v2 }
 0x294   :  { %1329 = vmatmul.mubr.msk.f32.vlgmr.msra.gmra.mrb[14].mxu0 %vm71_vm1, %v1768_v3 }
 0x295   :  { %1259 = vmatprep.mubr.f32.mxu0 %v1522_v2 }
 0x353   :  { %v1820_v13 = vpop.f32.mrb[6].mxu0 }
 0x354   :  { %v1822_v14 = vpop.f32.mrb[7].mxu0 }
 0x35b   :  { %v1392_v16 = vpop.f32.mrb[8].mxu0 }
 0x35c   :  { %v871_v17 = vpop.f32.mrb[9].mxu0  ;;  %v877_v4 = vadd.f32 %v1392_v16, %v1707_v31 }
 0x35d   :  { %v872_v22 = vadd.f32 %v871_v17, %v1703_v29 }
 0x35f   :  { %v1395_v60 = vpop.f32.mrb[10].mxu0  ;;  %890 = vxpose.xlu1.b32.start [1/4] (short) (narrow) %v872_v22, 16 }
 0x360   :  { %v881_v20 = vpop.f32.mrb[11].mxu0  ;;  %v887_v56 = vadd.f32 %v1395_v60, %v1709_v32 }
 0x361   :  { %v882_v3 = vadd.f32 %v881_v20, %v1705_v30  ;;  %v699_v20 = vpop.permute.xlu0 %698 }
 0x363   :  { %v1826_v5 = vpop.f32.mrb[12].mxu0  ;;  %891 = vxpose.xlu1.b32.cont [2/4] (short) (narrow) %v877_v4, 16 }
 0x364   :  { %v1406_v55 = vpop.f32.mrb[13].mxu0  ;;  %v1118_v60 = vadd.f32 %v1826_v5, %v1787_v50 }
 0x367   :  { %892 = vxpose.xlu1.b32.cont [3/4] (short) (narrow) %v882_v3, 16 }
 0x36b   :  { %893 = vxpose.xlu1.b32.end [4/4] (short) (narrow) %v887_v56, 16 }
 0x3df   :  { %v906_v57 = vpop.trf.xlu1 }
 0x3e0   :  { %1324 = vmatmul.mubr.msk.f32.vlgmr.msra.gmra.mrb[20].mxu1 %vm206_vm2, %v906_v57  ;;  %v701_v57 = vadd.f32 %v699_v20, %v1820_v13 }
 0x3e1   :  { %998 = vmatprep.mubr.f32.mxu1 %v1522_v2 }
 0x3e3   :  { %v907_v29 = vpop.trf.xlu1 }
 0x3e4   :  { %1325 = vmatmul.mubr.msk.f32.gmra.mrb[22].mxu1 %vm206_vm2, %v907_v29 }
 0x4b3   :  { %v994_v58 = vpop.f32.mrb[20].mxu1 }
 0x4b4   :  { %v996_v31 = vpop.f32.mrb[21].mxu1 }
 0x4b7   :  { %v1000_v59 = vpop.f32.mrb[22].mxu1 }
 0x4b8   :  { %v1005_v61 = vmax.f32 %v994_v58, %v1000_v59  ;;  %v1002_v33 = vpop.f32.mrb[23].mxu1 }
 0x4b9   :  { %v1012_v34 = vmax.f32 %v996_v31, %v1002_v33 }
 0x4ba   :  { %v1006_v62 = vrot.slane %v1005_v61, 4 }
 0x4bb   :  { %v1013_v30 = vrot.slane %v1012_v34, 4 }
 0x4bc   :  { %v1007_v63 = vmax.f32 %v1005_v61, %v1006_v62 }
 0x4bd   :  { %v1014_v0 = vmax.f32 %v1012_v34, %v1013_v30 }
 0x4be   :  { %v1008_v32 = vrot.slane %v1007_v63, 2 }
 0x4bf   :  { %v1015_v1 = vrot.slane %v1014_v0, 2 }
 0x4c0   :  { %v1009_v7 = vmax.f32 %v1007_v63, %v1008_v32 }
 0x4c1   :  { %v1016_v8 = vmax.f32 %v1014_v0, %v1015_v1 }
 0x4c2   :  { %v1010_v9 = vrot.slane %v1009_v7, 1 }
 0x4c3   :  { %v1017_v10 = vrot.slane %v1016_v8, 1 }
 0x4c4   :  { %v1011_v2 = vmax.f32 %v1009_v7, %v1010_v9 }
 0x4c5   :  { %v1018_v11 = vmax.f32 %v1016_v8, %v1017_v10 }
 0x4c6   :  { %v1019_v15 = vsub.f32 %v994_v58, %v1011_v2  ;;  %v1021_v6 = vsub.f32 %v1000_v59, %v1011_v2  ;;  %v702_v58 = vadd.f32 %v699_v20, %v1822_v14 }
 0x4c7   :  { %v1020_v18 = vsub.f32 %v996_v31, %v1018_v11  ;;  %v1022_v19 = vsub.f32 %v1002_v33, %v1018_v11 }
 0x4c8   :  { %v1023_v21 = vmul.f32 1.442695, %v1019_v15  ;;  %v1027_v23 = vmul.f32 1.442695, %v1021_v6 }
 0x4c9   :  { %v1025_v12 = vmul.f32 1.442695, %v1020_v18  ;;  %v1029_v39 = vmul.f32 1.442695, %v1022_v19 }
 0x4ca   :  { %1486 = vpow2.f32 %v1023_v21 }
 0x4cb   :  { %1488 = vpow2.f32 %v1027_v23 }
 0x4cc   :  { %1490 = vpow2.f32 %v1025_v12 }
 0x4cd   :  { %1492 = vpow2.f32 %v1029_v39 }
 0x4d4   :  { %v1487_v24 = vpop.eup %1486 }
 0x4d5   :  { %v1489_v40 = vpop.eup %1488 }
 0x4d6   :  { %v1491_v25 = vpop.eup %1490  ;;  %v1031_v26 = vadd.f32 %v1489_v40, %v1487_v24 }
 0x4d7   :  { %v1493_v27 = vpop.eup %1492 }
 0x4d8   :  { %v1032_v28 = vrot.slane %v1031_v26, 4  ;;  %v1038_v35 = vadd.f32 %v1493_v27, %v1491_v25 }
 0x4da   :  { %v1033_v36 = vadd.f32 %v1032_v28, %v1031_v26  ;;  %v1039_v37 = vrot.slane %v1038_v35, 4 }
 0x4dc   :  { %v1034_v38 = vrot.slane %v1033_v36, 2  ;;  %v1040_v41 = vadd.f32 %v1039_v37, %v1038_v35 }
 0x4de   :  { %v1035_v42 = vadd.f32 %v1034_v38, %v1033_v36  ;;  %v1041_v43 = vrot.slane %v1040_v41, 2 }
 0x4e0   :  { %v1036_v44 = vrot.slane %v1035_v42, 1  ;;  %v1042_v45 = vadd.f32 %v1041_v43, %v1040_v41 }
 0x4e2   :  { %v1037_v46 = vadd.f32 %v1036_v44, %v1035_v42  ;;  %v1043_v47 = vrot.slane %v1042_v45, 1 }
 0x4e4   :  { %1494 = vrcp.f32 %v1037_v46  ;;  %v1044_v48 = vadd.f32 %v1043_v47, %v1042_v45 }
 0x4e6   :  { %1496 = vrcp.f32 %v1044_v48 }
 0x4ee   :  { %v1495_v49 = vpop.eup %1494 }
 0x4ef   :  { %v1047_v51 = vmul.f32 %v1495_v49, %v1487_v24  ;;  %v1049_v52 = vmul.f32 %v1495_v49, %v1489_v40 }
 0x4f0   :  { %v1497_v53 = vpop.eup %1496 }
 0x4f1   :  { %v1048_v54 = vmul.f32 %v1497_v53, %v1491_v25  ;;  %v1050_v16 = vmul.f32 %v1497_v53, %v1493_v27  ;;  %v1457_v17 = vpack.c.bf16 %v1049_v52, %v1047_v51 }
 0x4f3   :  { %v1455_v22 = vpack.c.bf16 %v1050_v16, %v1048_v54 }
 0x4f5   :  { %1456 = vmatprep.subr.bf16.mxu0 %v1455_v22 }
 0x4f6   :  { %1458 = vmatpush1.bf16.msra.mxu0 %v1457_v17 }
 0x4f9   :  { %1330 = vmatmul.mubr.msk.f32.vlgmr.msra.gmra.mrb[14].mxu0 %vm620_vm4, %v1118_v60 }
 0x5cc   :  { %v1261_v4 = vpop.f32.mrb[14].mxu0 }
 0x5cd   :  { %v1266_v55 = vadd.f32 %v1261_v4, %v699_v20  ;;  %v1263_v3 = vpop.f32.mrb[15].mxu0 }
 0x5ce   :  { %v1267_v56 = vadd.f32 %v1263_v3, %v699_v20 }
 0x5cf   :  { %v1270_v29 = vrot.slane %v1266_v55, 4 }
 0x5d0   :  { %v1271_v31 = vrot.slane %v1267_v56, 4 }
 0x5d1   :  { %v1274_v59 = vsel %vm84_vm0, %v701_v57, %v1270_v29 }
 0x5d2   :  { %v1275_v50 = vsel %vm84_vm0, %v702_v58, %v1271_v31  ;;  %1276 = vst [vmem:[#allocation2] sm:$0xff] %v1274_v59 }
 0x5d3   :  { %1277 = vst [vmem:[#allocation2 + $0x8] sm:$0xff] %v1275_v50 }
 0x5d4   :  { %1509 = shalt.err (!%p1506_p4)
}
 0x5d5   :  { %s1510_s27 = scalar_lea.hbm %s1862_s10, 256 }
 0x5d6   :  { %p1511_p5 = scmp.ne.s32.totalorder %s1862_s10, %s1510_s27  ;;  %p1514_p6 = scmp.lt.u32.totalorder %s1510_s27, %s1862_s10 }
 0x5d8   :  { %p1516_p7 = pnand %p1514_p6, %p1511_p5 }
 0x5da   :  { %1519 = shalt.err (!%p1516_p7)
}
 0x5db   :  { %1287 = dma.vmem_to_hbm [thread:$0]  %s1285_s23, 256, %s1862_s10, [#allocation3]  }
 0x5dc   :  { %1520 = dma.done.wait [#allocation3], 256  }
 0x5dd   :  { %1521 = vsyncadd [#allocation3], 4294967040 }
 0x5de   :  { %1291 = vsyncpa [#allocation3], 1 }

</bundles_post_ra>
